<compile_context>
chip_gen: v7x
topology: tpu7x:2x2x1
jax: 0.10.0
libtpu: 0.0.40
codegen_flags: <defaults>
</compile_context>

<pallas_src>
import functools

import jax
import jax.numpy as jnp
from jax.experimental import pallas as pl
from jax.experimental.pallas import tpu as pltpu

_SQRT_HALF = 0.7071067811865476
_BN_EPS = 1e-5


def _erf(x):
    # Abramowitz & Stegun 7.1.26, |abs err| < 1.5e-7 (f32-noise-level GELU).
    # TODO(synk): switch to jax.lax.erf once its Mosaic lowering is guaranteed.
    p = 0.3275911
    a1, a2, a3, a4, a5 = (0.254829592, -0.284496736, 1.421413741,
                          -1.453152027, 1.061405429)
    sgn = jnp.where(x >= 0.0, 1.0, -1.0)
    ax = jnp.abs(x)
    t = 1.0 / (1.0 + p * ax)
    poly = ((((a5 * t + a4) * t + a3) * t + a2) * t + a1) * t
    return sgn * (1.0 - poly * jnp.exp(-ax * ax))


def _gelu(x):
    # nn.GELU() default = exact (erf-based) GELU.
    return 0.5 * x * (1.0 + _erf(x * _SQRT_HALF))


def _fused_kernel(a_ref, w_ref, gamma_ref, beta_ref, out_ref, sum_ref, sq_ref,
                  *, h, w, wp, n):
    """One grid step = one image: GELU + conv + BN-stat accumulation; the last
    step normalizes + GELUs the whole VMEM-resident batch output in place."""
    i = pl.program_id(0)
    r_out = h * wp

    @pl.when(i == 0)
    def _():
        sum_ref[...] = jnp.zeros_like(sum_ref)
        sq_ref[...] = jnp.zeros_like(sq_ref)

    # GELU(x + residual) on the padded channel-major image: (Cin, (h+3)*wp).
    g = _gelu(a_ref[0])

    # 3x3 conv as 9 shift-and-matmul taps: output index r = y*wp + x reads the
    # padded input at r + ky*wp + kx.  Static lane-offset slices + tiny
    # (Cout,Cin)x(Cin,h*wp) MXU matmuls -> lane-dense channel-major conv block.
    acc = None
    for ky in range(3):
        for kx in range(3):
            d = ky * wp + kx
            tap = jnp.dot(w_ref[3 * ky + kx], g[:, d:d + r_out],
                          preferred_element_type=jnp.float32)
            acc = tap if acc is None else acc + tap

    # Columns x >= w of each output row are padding garbage (finite; cropped by
    # the wrapper) -> mask them out of the BatchNorm statistics.  f32 floor-div
    # recovers x = r mod wp exactly while h*wp << 2^23.
    idx = jax.lax.broadcasted_iota(jnp.int32, (1, r_out), 1).astype(jnp.float32)
    xcol = idx - jnp.floor((idx + 0.5) * (1.0 / wp)) * wp
    valid = (xcol < float(w)).astype(jnp.float32)
    av = acc * valid
    sum_ref[...] += jnp.sum(av, axis=1, keepdims=True)          # (Cout, 1)
    sq_ref[...] += jnp.sum(av * acc, axis=1, keepdims=True)     # valid * acc^2

    # Park this image's conv output in the VMEM-resident (N, Cout, h*wp) block.
    out_ref[i] = acc

    @pl.when(i == pl.num_programs(0) - 1)
    def _():
        inv_count = 1.0 / float(n * h * w)
        mean = sum_ref[...] * inv_count                          # (Cout, 1)
        var = sq_ref[...] * inv_count - mean * mean
        scale = gamma_ref[...] * jax.lax.rsqrt(var + _BN_EPS)
        bias = beta_ref[...] - mean * scale
        out_ref[...] = _gelu(out_ref[...] * scale + bias)        # whole batch


def hourglass_decoding(x_nchw, res_nchw, weight, gamma, beta):
    """x_nchw, res_nchw: (N, Cin, H, W); weight: (Cout, Cin, 3, 3) (PyTorch).

    Returns (N, Cout, 2H, 2W) float32, matching HourGlassDecoding.forward with
    BatchNorm2d in training mode (batch statistics).
    """
    n, c_in, h, w = x_nchw.shape
    c_out = weight.shape[0]
    f32 = jnp.float32

    # Padded row pitch: 1 left zero column + w data columns + >=1 right zero
    # column, rounded to a multiple of 8 (so h*wp tends to hit lane multiples
    # and the channel-major output store stays fully lane dense).
    wp = ((w + 2 + 7) // 8) * 8
    hp = h + 3                      # 1 top + 2 bottom zero rows (slice slack
    l_in = hp * wp                  # for the ky=kx=2 tap on the last row)
    r_out = h * wp

    # Wrapper prep: sum + zero pad + flatten.  One small fused XLA copy; no
    # im2col or halo/band duplication in HBM.
    a = jnp.pad((x_nchw + res_nchw).astype(f32),
                ((0, 0), (0, 0), (1, 2), (1, wp - w - 1)))
    a = a.reshape(n, c_in, l_in)

    # (Cout, Cin, 3, 3) -> (ky*3+kx, Cout, Cin): each tap is a ready MXU LHS.
    w_cm = jnp.transpose(weight.astype(f32), (2, 3, 0, 1)).reshape(9, c_out, c_in)

    # Lane-padded VMEM budget: resident batch conv output + double-buffered
    # input + weights.  Kept well under 48 MiB (v7x has 64 MiB physical VMEM;
    # v5e/v6e have 128 MiB, where this could be pushed higher).
    _ceil = lambda v, m: (v + m - 1) // m * m
    resident = n * _ceil(c_out, 8) * _ceil(r_out, 128) * 4
    dbuf_in = 2 * _ceil(c_in, 8) * _ceil(l_in, 128) * 4
    wts = 9 * _ceil(c_out, 8) * 128 * 4
    vmem_need = resident + dbuf_in + wts + (256 << 10)
    # TODO(synk): fall back to a two-pass (stats, then apply) pipeline with a
    # "parallel" grid when the batch conv output cannot stay VMEM-resident
    # (vmem_need >~ 48 MiB on v7x) or when v7x 2-TC parallelism matters more
    # than the halved HBM traffic of this fused single pass.
    vmem_limit = int(min(48 << 20, max(32 << 20, 2 * vmem_need)))

    out = pl.pallas_call(
        functools.partial(_fused_kernel, h=h, w=w, wp=wp, n=n),
        out_shape=jax.ShapeDtypeStruct((n, c_out, r_out), f32),
        grid=(n,),
        in_specs=[
            pl.BlockSpec((1, c_in, l_in), lambda i: (i, 0, 0)),     # image i
            pl.BlockSpec((9, c_out, c_in), lambda i: (0, 0, 0)),    # weights
            pl.BlockSpec((c_out, 1), lambda i: (0, 0)),             # gamma
            pl.BlockSpec((c_out, 1), lambda i: (0, 0)),             # beta
        ],
        # Constant index_map: the whole batch's conv output stays resident in
        # VMEM across the grid and is written back once, lane dense.
        out_specs=pl.BlockSpec((n, c_out, r_out), lambda i: (0, 0, 0)),
        scratch_shapes=[pltpu.VMEM((c_out, 1), f32),    # BN sum accumulator
                        pltpu.VMEM((c_out, 1), f32)],   # BN sumsq accumulator
        compiler_params=pltpu.CompilerParams(
            dimension_semantics=("arbitrary",),   # BN stats carry across steps
            vmem_limit_bytes=vmem_limit),
    )(a, w_cm, gamma.astype(f32).reshape(c_out, 1),
      beta.astype(f32).reshape(c_out, 1))

    # TODO(synk): BatchNorm running_mean/running_var momentum updates are
    # training-only side state and are not materialized here.
    # Crop the width padding, 2x nearest upsample; already NCHW, so this is a
    # single fused XLA broadcast + reshape.
    y = out.reshape(n, c_out, h, wp)[:, :, :, :w]
    y = jnp.broadcast_to(y[:, :, :, None, :, None], (n, c_out, h, 2, w, 2))
    return y.reshape(n, c_out, 2 * h, 2 * w)


def _reference(x, r, weight, gamma, beta):
    """Pure-JAX reference (train-mode BN), for a correctness assert."""
    a = jax.nn.gelu(x + r, approximate=False)
    c = jax.lax.conv_general_dilated(
        a, weight, window_strides=(1, 1), padding=((1, 1), (1, 1)),
        dimension_numbers=("NCHW", "OIHW", "NCHW"))
    mean = jnp.mean(c, axis=(0, 2, 3), keepdims=True)
    var = jnp.mean(jnp.square(c - mean), axis=(0, 2, 3), keepdims=True)
    y = (c - mean) * jax.lax.rsqrt(var + _BN_EPS)
    y = y * gamma.reshape(1, -1, 1, 1) + beta.reshape(1, -1, 1, 1)
    y = jax.nn.gelu(y, approximate=False)
    return jnp.repeat(jnp.repeat(y, 2, axis=2), 2, axis=3)


if __name__ == "__main__":
    key = jax.random.PRNGKey(0)
    kx, kr, kw, kg, kb = jax.random.split(key, 5)

    N, C_IN, C_OUT, H, W = 2, 4, 8, 16, 16
    x = jax.random.normal(kx, (N, C_IN, H, W), jnp.float32)
    residual = jax.random.normal(kr, (N, C_IN, H, W), jnp.float32)

    # Deterministic synthetic parameters (shapes from the module __init__).
    weight = 0.2 * jax.random.normal(kw, (C_OUT, C_IN, 3, 3), jnp.float32)
    gamma = 1.0 + 0.1 * jax.random.normal(kg, (C_OUT,), jnp.float32)
    beta = 0.1 * jax.random.normal(kb, (C_OUT,), jnp.float32)

    out = jax.jit(hourglass_decoding)(x, residual, weight, gamma, beta)
    out = jax.block_until_ready(out)
    assert out.shape == (N, C_OUT, 2 * H, 2 * W), out.shape
    assert out.dtype == jnp.float32

    ref = _reference(x, residual, weight, gamma, beta)
    err = float(jnp.max(jnp.abs(out - ref)))
    assert err < 1e-3, f"max |err| vs reference = {err}"
    print("KERNEL_OK")
</pallas_src>

<mosaic_0001>
module attributes {stable_mosaic.version = 11 : i64} {
  func.func @_fused_kernel(%arg0: i32, %arg1: memref<1x4x456xf32, #tpu.memory_space<vmem>>, %arg2: memref<9x8x4xf32, #tpu.memory_space<vmem>>, %arg3: memref<8x1xf32, #tpu.memory_space<vmem>>, %arg4: memref<8x1xf32, #tpu.memory_space<vmem>>, %arg5: memref<2x8x384xf32, #tpu.memory_space<vmem>>, %arg6: memref<8x1xf32, #tpu.memory_space<vmem>>, %arg7: memref<8x1xf32, #tpu.memory_space<vmem>>) attributes {dimension_semantics = [#tpu.dimension_semantics<arbitrary>], iteration_bounds = array<i64: 2>, scalar_prefetch = 0 : i64, scratch_operands = 2 : i64, tpu.core_type = #tpu.core_type<tc>, window_params = [{transform_indices = @transform_0, window_bounds = array<i64: 1, 4, 456>}, {pipeline_mode = #tpu.pipeline_mode<synchronous>, transform_indices = @transform_1, window_bounds = array<i64: 9, 8, 4>}, {pipeline_mode = #tpu.pipeline_mode<synchronous>, transform_indices = @transform_2, window_bounds = array<i64: 8, 1>}, {pipeline_mode = #tpu.pipeline_mode<synchronous>, transform_indices = @transform_3, window_bounds = array<i64: 8, 1>}, {pipeline_mode = #tpu.pipeline_mode<synchronous>, transform_indices = @transform_4, window_bounds = array<i64: 2, 8, 384>}]} {
    %c0_i32 = arith.constant 0 : i32
    %0 = arith.cmpi eq, %arg0, %c0_i32 : i32
    %1 = arith.extui %0 : i1 to i32
    %c0_i32_0 = arith.constant 0 : i32
    %2 = arith.cmpi ne, %1, %c0_i32_0 : i32
    scf.if %2 {
      %cst_63 = arith.constant 0.000000e+00 : f32
      %124 = vector.broadcast %cst_63 : f32 to vector<8x1xf32>
      %c0_64 = arith.constant 0 : index
      %c0_65 = arith.constant 0 : index
      %125 = vector.load %arg6[%c0_64, %c0_65] : memref<8x1xf32, #tpu.memory_space<vmem>>, vector<8x1xf32>
      tpu.vector_store %arg6[%c0_64, %c0_65], %124 {strides = array<i32>} : memref<8x1xf32, #tpu.memory_space<vmem>>, vector<8x1xf32>,
      %cst_66 = arith.constant 0.000000e+00 : f32
      %126 = vector.broadcast %cst_66 : f32 to vector<8x1xf32>
      %c0_67 = arith.constant 0 : index
      %c0_68 = arith.constant 0 : index
      %127 = vector.load %arg7[%c0_67, %c0_68] : memref<8x1xf32, #tpu.memory_space<vmem>>, vector<8x1xf32>
      tpu.vector_store %arg7[%c0_67, %c0_68], %126 {strides = array<i32>} : memref<8x1xf32, #tpu.memory_space<vmem>>, vector<8x1xf32>,
    } else {
    }
    %c0 = arith.constant 0 : index
    %c0_1 = arith.constant 0 : index
    %c0_2 = arith.constant 0 : index
    %3 = vector.load %arg1[%c0, %c0_1, %c0_2] : memref<1x4x456xf32, #tpu.memory_space<vmem>>, vector<1x4x456xf32>
    %4 = vector.shape_cast %3 : vector<1x4x456xf32> to vector<4x456xf32>
    %cst = arith.constant 5.000000e-01 : f32
    %5 = vector.broadcast %cst : f32 to vector<4x456xf32>
    %6 = arith.mulf %5, %4 : vector<4x456xf32>
    %cst_3 = arith.constant 0.707106769 : f32
    %7 = vector.broadcast %cst_3 : f32 to vector<4x456xf32>
    %8 = arith.mulf %4, %7 : vector<4x456xf32>
    %cst_4 = arith.constant 0.000000e+00 : f32
    %9 = vector.broadcast %cst_4 : f32 to vector<4x456xf32>
    %10 = arith.cmpf oge, %8, %9 : vector<4x456xf32>
    %cst_5 = arith.constant 1.000000e+00 : f32
    %cst_6 = arith.constant -1.000000e+00 : f32
    %11 = vector.broadcast %cst_5 : f32 to vector<4x456xf32>
    %12 = vector.broadcast %cst_6 : f32 to vector<4x456xf32>
    %13 = arith.select %10, %11, %12 : vector<4x456xi1>, vector<4x456xf32>
    %14 = math.absf %8 : vector<4x456xf32>
    %cst_7 = arith.constant 0.327591091 : f32
    %15 = vector.broadcast %cst_7 : f32 to vector<4x456xf32>
    %16 = arith.mulf %15, %14 : vector<4x456xf32>
    %cst_8 = arith.constant 1.000000e+00 : f32
    %17 = vector.broadcast %cst_8 : f32 to vector<4x456xf32>
    %18 = arith.addf %17, %16 : vector<4x456xf32>
    %cst_9 = arith.constant 1.000000e+00 : f32
    %19 = vector.broadcast %cst_9 : f32 to vector<4x456xf32>
    %20 = arith.divf %19, %18 : vector<4x456xf32>
    %cst_10 = arith.constant 1.06140542 : f32
    %21 = vector.broadcast %cst_10 : f32 to vector<4x456xf32>
    %22 = arith.mulf %21, %20 : vector<4x456xf32>
    %cst_11 = arith.constant -1.45315206 : f32
    %23 = vector.broadcast %cst_11 : f32 to vector<4x456xf32>
    %24 = arith.addf %22, %23 : vector<4x456xf32>
    %25 = arith.mulf %24, %20 : vector<4x456xf32>
    %cst_12 = arith.constant 1.42141378 : f32
    %26 = vector.broadcast %cst_12 : f32 to vector<4x456xf32>
    %27 = arith.addf %25, %26 : vector<4x456xf32>
    %28 = arith.mulf %27, %20 : vector<4x456xf32>
    %cst_13 = arith.constant -0.284496725 : f32
    %29 = vector.broadcast %cst_13 : f32 to vector<4x456xf32>
    %30 = arith.addf %28, %29 : vector<4x456xf32>
    %31 = arith.mulf %30, %20 : vector<4x456xf32>
    %cst_14 = arith.constant 0.254829586 : f32
    %32 = vector.broadcast %cst_14 : f32 to vector<4x456xf32>
    %33 = arith.addf %31, %32 : vector<4x456xf32>
    %34 = arith.mulf %33, %20 : vector<4x456xf32>
    %cst_15 = arith.constant 0.000000e+00 : f32
    %35 = vector.broadcast %cst_15 : f32 to vector<4x456xf32>
    %36 = arith.subf %35, %14 : vector<4x456xf32>
    %37 = arith.mulf %36, %14 : vector<4x456xf32>
    %38 = math.exp %37 : vector<4x456xf32>
    %39 = arith.mulf %34, %38 : vector<4x456xf32>
    %cst_16 = arith.constant 1.000000e+00 : f32
    %40 = vector.broadcast %cst_16 : f32 to vector<4x456xf32>
    %41 = arith.subf %40, %39 : vector<4x456xf32>
    %42 = arith.mulf %13, %41 : vector<4x456xf32>
    %cst_17 = arith.constant 1.000000e+00 : f32
    %43 = vector.broadcast %cst_17 : f32 to vector<4x456xf32>
    %44 = arith.addf %43, %42 : vector<4x456xf32>
    %45 = arith.mulf %6, %44 : vector<4x456xf32>
    %c0_18 = arith.constant 0 : index
    %c0_19 = arith.constant 0 : index
    %c0_20 = arith.constant 0 : index
    %46 = vector.load %arg2[%c0_18, %c0_19, %c0_20] : memref<9x8x4xf32, #tpu.memory_space<vmem>>, vector<1x8x4xf32>
    %47 = vector.shape_cast %46 : vector<1x8x4xf32> to vector<8x4xf32>
    %48 = vector.extract_strided_slice %45 {offsets = [0, 0], sizes = [4, 384], strides = [1, 1]} : vector<4x456xf32> to vector<4x384xf32>
    %cst_21 = arith.constant dense<0.000000e+00> : vector<8x384xf32>
    %49 = tpu.matmul %47, %48, %cst_21 {dimension_numbers = #tpu.dot_dimension_numbers<[1], [0], [0], [1], [0, 0, 1, 1], [], []>} : vector<8x4xf32>, vector<4x384xf32>, vector<8x384xf32> -> vector<8x384xf32>
    %c1 = arith.constant 1 : index
    %c0_22 = arith.constant 0 : index
    %c0_23 = arith.constant 0 : index
    %50 = vector.load %arg2[%c1, %c0_22, %c0_23] : memref<9x8x4xf32, #tpu.memory_space<vmem>>, vector<1x8x4xf32>
    %51 = vector.shape_cast %50 : vector<1x8x4xf32> to vector<8x4xf32>
    %52 = vector.extract_strided_slice %45 {offsets = [0, 1], sizes = [4, 384], strides = [1, 1]} : vector<4x456xf32> to vector<4x384xf32>
    %cst_24 = arith.constant dense<0.000000e+00> : vector<8x384xf32>
    %53 = tpu.matmul %51, %52, %cst_24 {dimension_numbers = #tpu.dot_dimension_numbers<[1], [0], [0], [1], [0, 0, 1, 1], [], []>} : vector<8x4xf32>, vector<4x384xf32>, vector<8x384xf32> -> vector<8x384xf32>
    %54 = arith.addf %49, %53 : vector<8x384xf32>
    %c2 = arith.constant 2 : index
    %c0_25 = arith.constant 0 : index
    %c0_26 = arith.constant 0 : index
    %55 = vector.load %arg2[%c2, %c0_25, %c0_26] : memref<9x8x4xf32, #tpu.memory_space<vmem>>, vector<1x8x4xf32>
    %56 = vector.shape_cast %55 : vector<1x8x4xf32> to vector<8x4xf32>
    %57 = vector.extract_strided_slice %45 {offsets = [0, 2], sizes = [4, 384], strides = [1, 1]} : vector<4x456xf32> to vector<4x384xf32>
    %cst_27 = arith.constant dense<0.000000e+00> : vector<8x384xf32>
    %58 = tpu.matmul %56, %57, %cst_27 {dimension_numbers = #tpu.dot_dimension_numbers<[1], [0], [0], [1], [0, 0, 1, 1], [], []>} : vector<8x4xf32>, vector<4x384xf32>, vector<8x384xf32> -> vector<8x384xf32>
    %59 = arith.addf %54, %58 : vector<8x384xf32>
    %c3 = arith.constant 3 : index
    %c0_28 = arith.constant 0 : index
    %c0_29 = arith.constant 0 : index
    %60 = vector.load %arg2[%c3, %c0_28, %c0_29] : memref<9x8x4xf32, #tpu.memory_space<vmem>>, vector<1x8x4xf32>
    %61 = vector.shape_cast %60 : vector<1x8x4xf32> to vector<8x4xf32>
    %62 = vector.extract_strided_slice %45 {offsets = [0, 24], sizes = [4, 384], strides = [1, 1]} : vector<4x456xf32> to vector<4x384xf32>
    %cst_30 = arith.constant dense<0.000000e+00> : vector<8x384xf32>
    %63 = tpu.matmul %61, %62, %cst_30 {dimension_numbers = #tpu.dot_dimension_numbers<[1], [0], [0], [1], [0, 0, 1, 1], [], []>} : vector<8x4xf32>, vector<4x384xf32>, vector<8x384xf32> -> vector<8x384xf32>
    %64 = arith.addf %59, %63 : vector<8x384xf32>
    %c4 = arith.constant 4 : index
    %c0_31 = arith.constant 0 : index
    %c0_32 = arith.constant 0 : index
    %65 = vector.load %arg2[%c4, %c0_31, %c0_32] : memref<9x8x4xf32, #tpu.memory_space<vmem>>, vector<1x8x4xf32>
    %66 = vector.shape_cast %65 : vector<1x8x4xf32> to vector<8x4xf32>
    %67 = vector.extract_strided_slice %45 {offsets = [0, 25], sizes = [4, 384], strides = [1, 1]} : vector<4x456xf32> to vector<4x384xf32>
    %cst_33 = arith.constant dense<0.000000e+00> : vector<8x384xf32>
    %68 = tpu.matmul %66, %67, %cst_33 {dimension_numbers = #tpu.dot_dimension_numbers<[1], [0], [0], [1], [0, 0, 1, 1], [], []>} : vector<8x4xf32>, vector<4x384xf32>, vector<8x384xf32> -> vector<8x384xf32>
    %69 = arith.addf %64, %68 : vector<8x384xf32>
    %c5 = arith.constant 5 : index
    %c0_34 = arith.constant 0 : index
    %c0_35 = arith.constant 0 : index
    %70 = vector.load %arg2[%c5, %c0_34, %c0_35] : memref<9x8x4xf32, #tpu.memory_space<vmem>>, vector<1x8x4xf32>
    %71 = vector.shape_cast %70 : vector<1x8x4xf32> to vector<8x4xf32>
    %72 = vector.extract_strided_slice %45 {offsets = [0, 26], sizes = [4, 384], strides = [1, 1]} : vector<4x456xf32> to vector<4x384xf32>
    %cst_36 = arith.constant dense<0.000000e+00> : vector<8x384xf32>
    %73 = tpu.matmul %71, %72, %cst_36 {dimension_numbers = #tpu.dot_dimension_numbers<[1], [0], [0], [1], [0, 0, 1, 1], [], []>} : vector<8x4xf32>, vector<4x384xf32>, vector<8x384xf32> -> vector<8x384xf32>
    %74 = arith.addf %69, %73 : vector<8x384xf32>
    %c6 = arith.constant 6 : index
    %c0_37 = arith.constant 0 : index
    %c0_38 = arith.constant 0 : index
    %75 = vector.load %arg2[%c6, %c0_37, %c0_38] : memref<9x8x4xf32, #tpu.memory_space<vmem>>, vector<1x8x4xf32>
    %76 = vector.shape_cast %75 : vector<1x8x4xf32> to vector<8x4xf32>
    %77 = vector.extract_strided_slice %45 {offsets = [0, 48], sizes = [4, 384], strides = [1, 1]} : vector<4x456xf32> to vector<4x384xf32>
    %cst_39 = arith.constant dense<0.000000e+00> : vector<8x384xf32>
    %78 = tpu.matmul %76, %77, %cst_39 {dimension_numbers = #tpu.dot_dimension_numbers<[1], [0], [0], [1], [0, 0, 1, 1], [], []>} : vector<8x4xf32>, vector<4x384xf32>, vector<8x384xf32> -> vector<8x384xf32>
    %79 = arith.addf %74, %78 : vector<8x384xf32>
    %c7 = arith.constant 7 : index
    %c0_40 = arith.constant 0 : index
    %c0_41 = arith.constant 0 : index
    %80 = vector.load %arg2[%c7, %c0_40, %c0_41] : memref<9x8x4xf32, #tpu.memory_space<vmem>>, vector<1x8x4xf32>
    %81 = vector.shape_cast %80 : vector<1x8x4xf32> to vector<8x4xf32>
    %82 = vector.extract_strided_slice %45 {offsets = [0, 49], sizes = [4, 384], strides = [1, 1]} : vector<4x456xf32> to vector<4x384xf32>
    %cst_42 = arith.constant dense<0.000000e+00> : vector<8x384xf32>
    %83 = tpu.matmul %81, %82, %cst_42 {dimension_numbers = #tpu.dot_dimension_numbers<[1], [0], [0], [1], [0, 0, 1, 1], [], []>} : vector<8x4xf32>, vector<4x384xf32>, vector<8x384xf32> -> vector<8x384xf32>
    %84 = arith.addf %79, %83 : vector<8x384xf32>
    %c8 = arith.constant 8 : index
    %c0_43 = arith.constant 0 : index
    %c0_44 = arith.constant 0 : index
    %85 = vector.load %arg2[%c8, %c0_43, %c0_44] : memref<9x8x4xf32, #tpu.memory_space<vmem>>, vector<1x8x4xf32>
    %86 = vector.shape_cast %85 : vector<1x8x4xf32> to vector<8x4xf32>
    %87 = vector.extract_strided_slice %45 {offsets = [0, 50], sizes = [4, 384], strides = [1, 1]} : vector<4x456xf32> to vector<4x384xf32>
    %cst_45 = arith.constant dense<0.000000e+00> : vector<8x384xf32>
    %88 = tpu.matmul %86, %87, %cst_45 {dimension_numbers = #tpu.dot_dimension_numbers<[1], [0], [0], [1], [0, 0, 1, 1], [], []>} : vector<8x4xf32>, vector<4x384xf32>, vector<8x384xf32> -> vector<8x384xf32>
    %89 = arith.addf %84, %88 : vector<8x384xf32>
    %90 = tpu.iota {dimensions = array<i32: 1>} : vector<1x384xi32>
    %91 = arith.sitofp %90 : vector<1x384xi32> to vector<1x384xf32>
    %cst_46 = arith.constant 5.000000e-01 : f32
    %92 = vector.broadcast %cst_46 : f32 to vector<1x384xf32>
    %93 = arith.addf %91, %92 : vector<1x384xf32>
    %cst_47 = arith.constant 0.0416666679 : f32
    %94 = vector.broadcast %cst_47 : f32 to vector<1x384xf32>
    %95 = arith.mulf %93, %94 : vector<1x384xf32>
    %96 = math.floor %95 : vector<1x384xf32>
    %cst_48 = arith.constant 2.400000e+01 : f32
    %97 = vector.broadcast %cst_48 : f32 to vector<1x384xf32>
    %98 = arith.mulf %96, %97 : vector<1x384xf32>
    %99 = arith.subf %91, %98 : vector<1x384xf32>
    %cst_49 = arith.constant 1.600000e+01 : f32
    %100 = vector.broadcast %cst_49 : f32 to vector<1x384xf32>
    %101 = arith.cmpf olt, %99, %100 : vector<1x384xf32>
    %102 = arith.extui %101 : vector<1x384xi1> to vector<1x384xi32>
    %103 = arith.sitofp %102 : vector<1x384xi32> to vector<1x384xf32>
    %104 = vector.broadcast %103 : vector<1x384xf32> to vector<8x384xf32>
    %105 = arith.mulf %89, %104 : vector<8x384xf32>
    %c0_50 = arith.constant 0 : index
    %c0_51 = arith.constant 0 : index
    %106 = vector.load %arg6[%c0_50, %c0_51] : memref<8x1xf32, #tpu.memory_space<vmem>>, vector<8x1xf32>
    %cst_52 = arith.constant dense<0.000000e+00> : vector<8xf32>
    %107 = vector.multi_reduction <add>, %105, %cst_52 [1] : vector<8x384xf32> to vector<8xf32>
    %108 = vector.shape_cast %107 : vector<8xf32> to vector<8x1xf32>
    %109 = arith.addf %106, %108 : vector<8x1xf32>
    %c0_53 = arith.constant 0 : index
    %c0_54 = arith.constant 0 : index
    %110 = vector.load %arg6[%c0_53, %c0_54] : memref<8x1xf32, #tpu.memory_space<vmem>>, vector<8x1xf32>
    tpu.vector_store %arg6[%c0_53, %c0_54], %109 {strides = array<i32>} : memref<8x1xf32, #tpu.memory_space<vmem>>, vector<8x1xf32>,
    %c0_55 = arith.constant 0 : index
    %c0_56 = arith.constant 0 : index
    %111 = vector.load %arg7[%c0_55, %c0_56] : memref<8x1xf32, #tpu.memory_space<vmem>>, vector<8x1xf32>
    %112 = arith.mulf %105, %89 : vector<8x384xf32>
    %cst_57 = arith.constant dense<0.000000e+00> : vector<8xf32>
    %113 = vector.multi_reduction <add>, %112, %cst_57 [1] : vector<8x384xf32> to vector<8xf32>
    %114 = vector.shape_cast %113 : vector<8xf32> to vector<8x1xf32>
    %115 = arith.addf %111, %114 : vector<8x1xf32>
    %c0_58 = arith.constant 0 : index
    %c0_59 = arith.constant 0 : index
    %116 = vector.load %arg7[%c0_58, %c0_59] : memref<8x1xf32, #tpu.memory_space<vmem>>, vector<8x1xf32>
    tpu.vector_store %arg7[%c0_58, %c0_59], %115 {strides = array<i32>} : memref<8x1xf32, #tpu.memory_space<vmem>>, vector<8x1xf32>,
    %117 = arith.index_cast %arg0 : i32 to index
    %c0_60 = arith.constant 0 : index
    %c0_61 = arith.constant 0 : index
    %118 = vector.load %arg5[%117, %c0_60, %c0_61] : memref<2x8x384xf32, #tpu.memory_space<vmem>>, vector<1x8x384xf32>
    %119 = vector.shape_cast %118 : vector<1x8x384xf32> to vector<8x384xf32>
    %120 = vector.shape_cast %89 : vector<8x384xf32> to vector<1x8x384xf32>
    tpu.vector_store %arg5[%117, %c0_60, %c0_61], %120 {strides = array<i32>} : memref<2x8x384xf32, #tpu.memory_space<vmem>>, vector<1x8x384xf32>,
    %c1_i32 = arith.constant 1 : i32
    %121 = arith.cmpi eq, %arg0, %c1_i32 : i32
    %122 = arith.extui %121 : i1 to i32
    %c0_i32_62 = arith.constant 0 : i32
    %123 = arith.cmpi ne, %122, %c0_i32_62 : i32
    scf.if %123 {
      %c0_63 = arith.constant 0 : index
      %c0_64 = arith.constant 0 : index
      %124 = vector.load %arg6[%c0_63, %c0_64] : memref<8x1xf32, #tpu.memory_space<vmem>>, vector<8x1xf32>
      %cst_65 = arith.constant 0.001953125 : f32
      %125 = vector.broadcast %cst_65 : f32 to vector<8x1xf32>
      %126 = arith.mulf %124, %125 : vector<8x1xf32>
      %c0_66 = arith.constant 0 : index
      %c0_67 = arith.constant 0 : index
      %127 = vector.load %arg7[%c0_66, %c0_67] : memref<8x1xf32, #tpu.memory_space<vmem>>, vector<8x1xf32>
      %cst_68 = arith.constant 0.001953125 : f32
      %128 = vector.broadcast %cst_68 : f32 to vector<8x1xf32>
      %129 = arith.mulf %127, %128 : vector<8x1xf32>
      %130 = arith.mulf %126, %126 : vector<8x1xf32>
      %131 = arith.subf %129, %130 : vector<8x1xf32>
      %c0_69 = arith.constant 0 : index
      %c0_70 = arith.constant 0 : index
      %132 = vector.load %arg3[%c0_69, %c0_70] : memref<8x1xf32, #tpu.memory_space<vmem>>, vector<8x1xf32>
      %cst_71 = arith.constant 9.99999974E-6 : f32
      %133 = vector.broadcast %cst_71 : f32 to vector<8x1xf32>
      %134 = arith.addf %131, %133 : vector<8x1xf32>
      %135 = math.rsqrt %134 : vector<8x1xf32>
      %136 = arith.mulf %132, %135 : vector<8x1xf32>
      %c0_72 = arith.constant 0 : index
      %c0_73 = arith.constant 0 : index
      %137 = vector.load %arg4[%c0_72, %c0_73] : memref<8x1xf32, #tpu.memory_space<vmem>>, vector<8x1xf32>
      %138 = arith.mulf %126, %136 : vector<8x1xf32>
      %139 = arith.subf %137, %138 : vector<8x1xf32>
      %c0_74 = arith.constant 0 : index
      %c0_75 = arith.constant 0 : index
      %c0_76 = arith.constant 0 : index
      %140 = vector.load %arg5[%c0_74, %c0_75, %c0_76] : memref<2x8x384xf32, #tpu.memory_space<vmem>>, vector<2x8x384xf32>
      %141 = vector.shape_cast %136 : vector<8x1xf32> to vector<1x8x1xf32>
      %142 = vector.broadcast %141 : vector<1x8x1xf32> to vector<2x8x384xf32>
      %143 = arith.mulf %140, %142 : vector<2x8x384xf32>
      %144 = vector.shape_cast %139 : vector<8x1xf32> to vector<1x8x1xf32>
      %145 = vector.broadcast %144 : vector<1x8x1xf32> to vector<2x8x384xf32>
      %146 = arith.addf %143, %145 : vector<2x8x384xf32>
      %cst_77 = arith.constant 5.000000e-01 : f32
      %147 = vector.broadcast %cst_77 : f32 to vector<2x8x384xf32>
      %148 = arith.mulf %147, %146 : vector<2x8x384xf32>
      %cst_78 = arith.constant 0.707106769 : f32
      %149 = vector.broadcast %cst_78 : f32 to vector<2x8x384xf32>
      %150 = arith.mulf %146, %149 : vector<2x8x384xf32>
      %cst_79 = arith.constant 0.000000e+00 : f32
      %151 = vector.broadcast %cst_79 : f32 to vector<2x8x384xf32>
      %152 = arith.cmpf oge, %150, %151 : vector<2x8x384xf32>
      %cst_80 = arith.constant 1.000000e+00 : f32
      %cst_81 = arith.constant -1.000000e+00 : f32
      %153 = vector.broadcast %cst_80 : f32 to vector<2x8x384xf32>
      %154 = vector.broadcast %cst_81 : f32 to vector<2x8x384xf32>
      %155 = arith.select %152, %153, %154 : vector<2x8x384xi1>, vector<2x8x384xf32>
      %156 = math.absf %150 : vector<2x8x384xf32>
      %cst_82 = arith.constant 0.327591091 : f32
      %157 = vector.broadcast %cst_82 : f32 to vector<2x8x384xf32>
      %158 = arith.mulf %157, %156 : vector<2x8x384xf32>
      %cst_83 = arith.constant 1.000000e+00 : f32
      %159 = vector.broadcast %cst_83 : f32 to vector<2x8x384xf32>
      %160 = arith.addf %159, %158 : vector<2x8x384xf32>
      %cst_84 = arith.constant 1.000000e+00 : f32
      %161 = vector.broadcast %cst_84 : f32 to vector<2x8x384xf32>
      %162 = arith.divf %161, %160 : vector<2x8x384xf32>
      %cst_85 = arith.constant 1.06140542 : f32
      %163 = vector.broadcast %cst_85 : f32 to vector<2x8x384xf32>
      %164 = arith.mulf %163, %162 : vector<2x8x384xf32>
      %cst_86 = arith.constant -1.45315206 : f32
      %165 = vector.broadcast %cst_86 : f32 to vector<2x8x384xf32>
      %166 = arith.addf %164, %165 : vector<2x8x384xf32>
      %167 = arith.mulf %166, %162 : vector<2x8x384xf32>
      %cst_87 = arith.constant 1.42141378 : f32
      %168 = vector.broadcast %cst_87 : f32 to vector<2x8x384xf32>
      %169 = arith.addf %167, %168 : vector<2x8x384xf32>
      %170 = arith.mulf %169, %162 : vector<2x8x384xf32>
      %cst_88 = arith.constant -0.284496725 : f32
      %171 = vector.broadcast %cst_88 : f32 to vector<2x8x384xf32>
      %172 = arith.addf %170, %171 : vector<2x8x384xf32>
      %173 = arith.mulf %172, %162 : vector<2x8x384xf32>
      %cst_89 = arith.constant 0.254829586 : f32
      %174 = vector.broadcast %cst_89 : f32 to vector<2x8x384xf32>
      %175 = arith.addf %173, %174 : vector<2x8x384xf32>
      %176 = arith.mulf %175, %162 : vector<2x8x384xf32>
      %cst_90 = arith.constant 0.000000e+00 : f32
      %177 = vector.broadcast %cst_90 : f32 to vector<2x8x384xf32>
      %178 = arith.subf %177, %156 : vector<2x8x384xf32>
      %179 = arith.mulf %178, %156 : vector<2x8x384xf32>
      %180 = math.exp %179 : vector<2x8x384xf32>
      %181 = arith.mulf %176, %180 : vector<2x8x384xf32>
      %cst_91 = arith.constant 1.000000e+00 : f32
      %182 = vector.broadcast %cst_91 : f32 to vector<2x8x384xf32>
      %183 = arith.subf %182, %181 : vector<2x8x384xf32>
      %184 = arith.mulf %155, %183 : vector<2x8x384xf32>
      %cst_92 = arith.constant 1.000000e+00 : f32
      %185 = vector.broadcast %cst_92 : f32 to vector<2x8x384xf32>
      %186 = arith.addf %185, %184 : vector<2x8x384xf32>
      %187 = arith.mulf %148, %186 : vector<2x8x384xf32>
      %c0_93 = arith.constant 0 : index
      %c0_94 = arith.constant 0 : index
      %c0_95 = arith.constant 0 : index
      %188 = vector.load %arg5[%c0_93, %c0_94, %c0_95] : memref<2x8x384xf32, #tpu.memory_space<vmem>>, vector<2x8x384xf32>
      tpu.vector_store %arg5[%c0_93, %c0_94, %c0_95], %187 {strides = array<i32>} : memref<2x8x384xf32, #tpu.memory_space<vmem>>, vector<2x8x384xf32>,
    } else {
    }
    return
  }
  func.func @transform_0(%arg0: i32) -> (i32, i32, i32) {
    %c0_i32 = arith.constant 0 : i32
    %c0_i32_0 = arith.constant 0 : i32
    %c0_i32_1 = arith.constant 0 : i32
    return %arg0, %c0_i32, %c0_i32_0 : i32, i32, i32
  }
  func.func @transform_1(%arg0: i32) -> (i32, i32, i32) {
    %c0_i32 = arith.constant 0 : i32
    %c0_i32_0 = arith.constant 0 : i32
    %c0_i32_1 = arith.constant 0 : i32
    %c0_i32_2 = arith.constant 0 : i32
    return %c0_i32, %c0_i32_0, %c0_i32_1 : i32, i32, i32
  }
  func.func @transform_2(%arg0: i32) -> (i32, i32) {
    %c0_i32 = arith.constant 0 : i32
    %c0_i32_0 = arith.constant 0 : i32
    %c0_i32_1 = arith.constant 0 : i32
    return %c0_i32, %c0_i32_0 : i32, i32
  }
  func.func @transform_3(%arg0: i32) -> (i32, i32) {
    %c0_i32 = arith.constant 0 : i32
    %c0_i32_0 = arith.constant 0 : i32
    %c0_i32_1 = arith.constant 0 : i32
    return %c0_i32, %c0_i32_0 : i32, i32
  }
  func.func @transform_4(%arg0: i32) -> (i32, i32, i32) {
    %c0_i32 = arith.constant 0 : i32
    %c0_i32_0 = arith.constant 0 : i32
    %c0_i32_1 = arith.constant 0 : i32
    %c0_i32_2 = arith.constant 0 : i32
    return %c0_i32, %c0_i32_0, %c0_i32_1 : i32, i32, i32
  }
}

</mosaic_0001>

<bundles_post_ra>
// kernel: hourglass_decoding.1
= control target key start
LH: loop header
LB: loop body
LE: loop exit
PB: predicated region body
PF: predicated region fallthrough
CT: control target
= control target key end

     0   :  { %s2305_s15 = smov 0   ;;  %s2636_s0 = inlined_call_operand.vmem [shape: f32[2,4,456], index: 0, kind: input, shape index: {}]   ;;  %s2637_s1 = inlined_call_operand.vmem [shape: f32[9,8,4], index: 1, kind: input, shape index: {}]   ;;  %s2638_s2 = inlined_call_operand.vmem [shape: f32[8,1], index: 2, kind: input, shape index: {}]   ;;  %s2639_s3 = inlined_call_operand.vmem [shape: f32[8,1], index: 3, kind: input, shape index: {}]   ;;  %s2640_s4 = inlined_call_operand.vmem [shape: f32[2,8,384], index: 4, kind: output, shape index: {}]  }
   0x1 LB: > { %s2311_s16 = sadd.s32 4294967295, %s2264_s15   ;;  %p2040_p0 = scmp.ge.s32.totalorder %s2264_s15, 1  ;;  %s2264_s15 = sphi %s2305_s15, %s14_s15  }
   0x2   : > { %p157_p1 = scmp.lt.s32.totalorder %s2264_s15, 3 }
   0x4   : > { %p158_p2 = pnand %p2040_p0, %p157_p1 }
   0x5   : > { %p178_p3 = scmp.lt.s32.totalorder (!%p158_p2), %s2311_s16, 1  ;;  %p2043_p4 = scmp.ne.s32.totalorder (!%p158_p2), %s2311_s16, 0 }
   0x6   : > { %161 = sbr.rel (%p158_p2) target bundleno = 836 (0x344), region = 36 }
   0xd   : > { %s179_s17 = scalar_select %p178_p3, %s2311_s16, 1 }
   0xe   : > { %186 = sbr.rel (%p2043_p4) target bundleno = 21 (0x15), region = 40  ;;  %vm187_vm0 = vcmask (!%p2043_p4), 7168   ;;  %v2266_v0 = vmov (!%p2043_p4), 0.0  }
   0xf   : > { %s2104_s18 = sshll.u32 %s179_s17, 4  ;;  %188 = vst.msk [vmem:[#allocation2] sm:$0xff] (!%p2043_p4), %vm187_vm0, %v2266_v0  ;;  %189 = vst.msk [vmem:[#allocation3] sm:$0xff] (!%p2043_p4), %vm187_vm0, %v2266_v0 }
  0x10   : > { %s182_s21 = scalar_lea.vmem %s2636_s0, %s2104_s18 }
  0x15 PF: > { %v190_v1 = vld [vmem:[%s182_s21] sm:$0xff]  ;;  %v191_v2 = vld [vmem:[%s182_s21 + $0x8] sm:$0xff]  ;;  %v2267_v40 = vmov -1.0   ;;  %v2268_v46 = vmov 0.0   ;;  %vm2269_vm3 = vmmov 0   ;;  %s2270_s22 = smov 127  }
  0x16   : > { %v194_v3 = vmul.f32 0.70710677, %v190_v1  ;;  %v195_v4 = vmul.f32 0.70710677, %v191_v2  ;;  %2124 = vmatprep.subr.mxu1 %v2268_v46  ;;  %340 = vmatprep.mubr.f32.mxu0 %v2268_v46  ;;  %v192_v47 = vmul.f32 0.5, %v190_v1  ;;  %v193_v49 = vmul.f32 0.5, %v191_v2 }
  0x17   : > { %2126 = vmatprep.mubr.msk.f32.mxu1 %vm2269_vm3, %v2268_v46  ;;  %s2271_s23 = smov 126   ;;  %s2272_s24 = smov 104   ;;  %vm261_vm4 = vcmask 1039360   ;;  %vm269_vm5 = vcmask 1043456   ;;  %v2044_v61 = vld [vmem:[%s2637_s1 + $0x8] sm:$0xff]  ;;  %vm265_vm6 = vcmask 31744  }
  0x18   : > { %v200_v5 = vand.u32 2147483647, %v194_v3  ;;  %v201_v6 = vand.u32 2147483647, %v195_v4  ;;  %vm196_vm1 = vcmp.ge.f32.partialorder %v194_v3, 0.0  ;;  %vm197_vm2 = vcmp.ge.f32.partialorder %v195_v4, 0.0 }
  0x19   : > { %v198_v41 = vsel %vm196_vm1, 1.0, %v2267_v40  ;;  %v199_v43 = vsel %vm197_vm2, 1.0, %v2267_v40  ;;  %s2273_s25 = smov 103   ;;  %s2274_s26 = smov 102   ;;  %vm577_vm7 = vcmask 1031168   ;;  %vm744_vm8 = vcmask 850944  }
  0x1a   : > { %v202_v7 = vmul.f32 0.3275911, %v200_v5  ;;  %v203_v8 = vmul.f32 0.3275911, %v201_v6  ;;  %v228_v11 = vsub.f32 0.0, %v200_v5  ;;  %v229_v12 = vsub.f32 0.0, %v201_v6 }
  0x1b   : > { %s2275_s27 = smov 80   ;;  %s2276_s28 = smov 79   ;;  %vm911_vm9 = vcmask 842752   ;;  %vm1078_vm10 = vcmask 834560   ;;  %vm1245_vm11 = vcmask 654336   ;;  %vm1412_vm12 = vcmask 646144  }
  0x1c   : > { %v204_v9 = vadd.f32 1.0, %v202_v7  ;;  %v205_v10 = vadd.f32 1.0, %v203_v8  ;;  %v230_v13 = vmul.f32 %v228_v11, %v200_v5  ;;  %v231_v14 = vmul.f32 %v229_v12, %v201_v6  ;;  %s2277_s29 = smov 78   ;;  %v246_v6 = vld [vmem:[%s2637_s1] sm:$0xff]  ;;  %p2101_p5 = scmp.ne.s32.totalorder %s2311_s16, 1 }
  0x1d   : > { %vm1579_vm13 = vcmask 637952   ;;  %vm1776_vm1 = vcmask 7168  }
  0x1e   : > { %2223 = vrcp.f32 %v204_v9  ;;  %v232_v19 = vmul.f32 1.442695, %v230_v13  ;;  %v234_v21 = vmul.f32 1.442695, %v231_v14  ;;  %v2055_v14 = vld [vmem:[%s2637_s1 + $0x10] sm:$0xff] }
  0x1f   : > { %2225 = vrcp.f32 %v205_v10 }
  0x20   : > { %2227 = vpow2.f32 %v232_v19 }
  0x21   : > { %2229 = vpow2.f32 %v234_v21 }
  0x28   : > { %v2224_v15 = vpop.eup %2223 }
  0x29   : > { %v2226_v16 = vpop.eup %2225  ;;  %v210_v17 = vmul.f32 1.0614054, %v2224_v15 }
  0x2a   : > { %v211_v18 = vmul.f32 1.0614054, %v2226_v16  ;;  %v2228_v34 = vpop.eup %2227 }
  0x2b   : > { %v212_v20 = vadd.f32 -1.4531521, %v210_v17  ;;  %v2230_v36 = vpop.eup %2229 }
  0x2c   : > { %v213_v22 = vadd.f32 -1.4531521, %v211_v18 }
  0x2d   : > { %v214_v23 = vmul.f32 %v2224_v15, %v212_v20 }
  0x2e   : > { %v215_v24 = vmul.f32 %v2226_v16, %v213_v22  ;;  %v2061_v22 = vld [vmem:[%s2637_s1 + $0x18] sm:$0xff] }
  0x2f   : > { %v216_v25 = vadd.f32 1.4214138, %v214_v23 }
  0x30   : > { %v217_v26 = vadd.f32 1.4214138, %v215_v24 }
  0x31   : > { %v218_v27 = vmul.f32 %v2224_v15, %v216_v25 }
  0x32   : > { %v219_v28 = vmul.f32 %v2226_v16, %v217_v26 }
  0x33   : > { %v220_v29 = vadd.f32 -0.28449672, %v218_v27 }
  0x34   : > { %v221_v30 = vadd.f32 -0.28449672, %v219_v28 }
  0x35   : > { %v222_v31 = vmul.f32 %v2224_v15, %v220_v29 }
  0x36   : > { %v223_v32 = vmul.f32 %v2226_v16, %v221_v30  ;;  %v2067_v30 = vld [vmem:[%s2637_s1 + $0x20] sm:$0xff] }
  0x37   : > { %v224_v33 = vadd.f32 0.2548296, %v222_v31 }
  0x38   : > { %v225_v35 = vadd.f32 0.2548296, %v223_v32 }
  0x39   : > { %v226_v37 = vmul.f32 %v2224_v15, %v224_v33 }
  0x3a   : > { %v227_v38 = vmul.f32 %v2226_v16, %v225_v35 }
  0x3b   : > { %v236_v39 = vmul.f32 %v2228_v34, %v226_v37 }
  0x3c   : > { %v237_v42 = vmul.f32 %v2230_v36, %v227_v38  ;;  %v2073_v38 = vld [vmem:[%s2637_s1 + $0x28] sm:$0xff] }
  0x3d   : > { %v238_v44 = vsub.f32 1.0, %v236_v39 }
  0x3e   : > { %v239_v45 = vsub.f32 1.0, %v237_v42 }
  0x3f   : > { %v240_v48 = vmul.f32 %v238_v44, %v198_v41 }
  0x40   : > { %v241_v50 = vmul.f32 %v239_v45, %v199_v43 }
  0x41   : > { %v242_v51 = vadd.f32 1.0, %v240_v48 }
  0x42   : > { %v243_v52 = vadd.f32 1.0, %v241_v50 }
  0x43   : > { %v2325_v53 = vmul.f32 %v242_v51, %v192_v47  ;;  %v2079_v47 = vld [vmem:[%s2637_s1 + $0x30] sm:$0xff] }
  0x44   : > { %v2327_v54 = vmul.f32 %v243_v52, %v193_v49 }
  0x45   : > { %253 = vrot.lane.b32.xlu1 %v2325_v53, %s2270_s22  ;;  %v251_v55 = vcombine.high %v2325_v53, %v2325_v53 }
  0x46   : > { %v252_v56 = vcombine.high %v2327_v54, %v2327_v54 }
  0x47   : > { %255 = vrot.lane.b32.xlu0 %v251_v55, %s2270_s22 }
  0x49   : > { %259 = vrot.lane.b32.xlu1 %v252_v56, %s2270_s22 }
  0x4b   : > { %257 = vrot.lane.b32.xlu0 %v2327_v54, %s2270_s22 }
  0x4d   : > { %573 = vrot.lane.b32.xlu1 %v2327_v54, %s2271_s23 }
  0x4f   : > { %571 = vrot.lane.b32.xlu0 %v251_v55, %s2271_s23 }
  0x51   : > { %575 = vrot.lane.b32.xlu1 %v252_v56, %s2271_s23 }
  0x53   : > { %569 = vrot.lane.b32.xlu0 %v2325_v53, %s2271_s23 }
  0x55   : > { %740 = vrot.lane.b32.xlu1 %v2327_v54, %s2272_s24 }
  0x57   : > { %738 = vrot.lane.b32.xlu0 %v251_v55, %s2272_s24 }
  0x59   : > { %742 = vrot.lane.b32.xlu1 %v252_v56, %s2272_s24 }
  0x5b   : > { %736 = vrot.lane.b32.xlu0 %v2325_v53, %s2272_s24  ;;  %s2105_s24 = smul.u32 24, %s2311_s16 }
  0x5d   : > { %907 = vrot.lane.b32.xlu1 %v2327_v54, %s2273_s25 }
  0x5f   : > { %905 = vrot.lane.b32.xlu0 %v251_v55, %s2273_s25 }
  0x61   : > { %909 = vrot.lane.b32.xlu1 %v252_v56, %s2273_s25 }
  0x63   : > { %903 = vrot.lane.b32.xlu0 %v2325_v53, %s2273_s25 }
  0x65   : > { %1074 = vrot.lane.b32.xlu1 %v2327_v54, %s2274_s26 }
  0x67   : > { %1072 = vrot.lane.b32.xlu0 %v251_v55, %s2274_s26 }
  0x69   : > { %1076 = vrot.lane.b32.xlu1 %v252_v56, %s2274_s26 }
  0x6b   : > { %1070 = vrot.lane.b32.xlu0 %v2325_v53, %s2274_s26 }
  0x6d   : > { %1241 = vrot.lane.b32.xlu1 %v2327_v54, %s2275_s27 }
  0x6f   : > { %1239 = vrot.lane.b32.xlu0 %v251_v55, %s2275_s27 }
  0x71   : > { %1243 = vrot.lane.b32.xlu1 %v252_v56, %s2275_s27 }
  0x73   : > { %1237 = vrot.lane.b32.xlu0 %v2325_v53, %s2275_s27  ;;  %s1790_s27 = scalar_lea.vmem %s2640_s4, %s2105_s24 }
  0x75   : > { %1408 = vrot.lane.b32.xlu1 %v2327_v54, %s2276_s28 }
  0x77   : > { %1406 = vrot.lane.b32.xlu0 %v251_v55, %s2276_s28 }
  0x79   : > { %1410 = vrot.lane.b32.xlu1 %v252_v56, %s2276_s28 }
  0x7b   : > { %1404 = vrot.lane.b32.xlu0 %v2325_v53, %s2276_s28 }
  0x7d   : > { %1575 = vrot.lane.b32.xlu1 %v2327_v54, %s2277_s29 }
  0x7f   : > { %1573 = vrot.lane.b32.xlu0 %v251_v55, %s2277_s29 }
  0x81   : > { %1577 = vrot.lane.b32.xlu1 %v252_v56, %s2277_s29 }
  0x83   : > { %1571 = vrot.lane.b32.xlu0 %v2325_v53, %s2277_s29 }
  0xb7   : > { %v254_v57 = vpop.permute.xlu1 %253 }
  0xb9   : > { %v256_v58 = vpop.permute.xlu0 %255 }
  0xba   : > { %v262_v0 = vsel %vm261_vm4, %v254_v57, %v256_v58 }
  0xbb   : > { %v260_v59 = vpop.permute.xlu1 %259 }
  0xbd   : > { %v258_v60 = vpop.permute.xlu0 %257 }
  0xbe   : > { %v263_v62 = vsel %vm261_vm4, %v256_v58, %v258_v60  ;;  %v264_v63 = vsel %vm261_vm4, %v258_v60, %v260_v59  ;;  %v2091_v58 = vld [vmem:[%s2637_s1 + $0x40] sm:$0xff]  ;;  %v1736_v59 = vlaneseq }
  0xbf   : > { %2045 = vmatprep.subr.msk.mxu0 %vm269_vm5, %v263_v62  ;;  %2125 = vmatpush3.msk.msra.mxu1 %vm269_vm5, %v264_v63  ;;  %v574_v1 = vpop.permute.xlu1 %573 }
  0xc0   : > { %2046 = vmatpush1.msk.msra.mxu0 %vm269_vm5, %v262_v0  ;;  %2127 = vmatmul.mubr.msk.f32.vlgmr.msra.gmra.mrb[0].mxu1 %vm265_vm6, %v2044_v61  ;;  %v1737_v60 = vand.u32 127, %v1736_v59 }
  0xc1   : > { %2047 = vmatmul.mubr.msk.f32.vlgmr.msra.gmra.mrb[0].mxu0 %vm265_vm6, %v2044_v61  ;;  %2050 = vmatprep.subr.msk.mxu0 %vm269_vm5, %v251_v55  ;;  %v572_v2 = vpop.permute.xlu0 %571  ;;  %v2085_v55 = vld [vmem:[%s2637_s1 + $0x38] sm:$0xff] }
  0xc2   : > { %2051 = vmatpush1.msk.msra.mxu0 %vm269_vm5, %v2325_v53  ;;  %v579_v3 = vsel %vm577_vm7, %v572_v2, %v574_v1  ;;  %2129 = vmatprep.subr.mxu1 %v2268_v46  ;;  %v1738_v61 = vadd.s32 128, %v1737_v60  ;;  %v1739_v62 = vadd.s32 256, %v1737_v60  ;;  %v1740_v63 = vcvt.s32.f32 %v1737_v60 }
  0xc3   : > { %2130 = vmatpush3.msk.msra.mxu1 %vm269_vm5, %v2327_v54  ;;  %2056 = vmatprep.subr.msk.mxu0 %vm269_vm5, %v579_v3  ;;  %v576_v4 = vpop.permute.xlu1 %575 }
  0xc4   : > { %2131 = vmatprep.mubr.msk.f32.mxu1 %vm2269_vm3, %v2268_v46  ;;  %490 = vmatprep.mubr.f32.mxu0 %v2268_v46  ;;  %v580_v7 = vsel %vm577_vm7, %v574_v1, %v576_v4  ;;  %v1741_v0 = vcvt.s32.f32 %v1738_v61  ;;  %v1742_v1 = vcvt.s32.f32 %v1739_v62 }
  0xc5   : > { %v570_v5 = vpop.permute.xlu0 %569  ;;  %2134 = vmatprep.subr.mxu1 %v2268_v46 }
  0xc6   : > { %v578_v8 = vsel %vm577_vm7, %v570_v5, %v572_v2  ;;  %v1743_v2 = vadd.f32 0.5, %v1740_v63  ;;  %v1744_v3 = vadd.f32 0.5, %v1741_v0  ;;  %v1745_v4 = vadd.f32 0.5, %v1742_v1 }
  0xc7   : > { %v741_v9 = vpop.permute.xlu1 %740 }
  0xc8   : > { %2132 = vmatmul.mubr.msk.f32.vlgmr.msra.gmra.mrb[0].mxu1 %vm265_vm6, %v246_v6  ;;  %v1746_v5 = vmul.f32 0.041666668, %v1743_v2 }
  0xc9   : > { %2052 = vmatmul.mubr.msk.f32.vlgmr.msra.gmra.mrb[0].mxu0 %vm265_vm6, %v246_v6  ;;  %2135 = vmatpush3.msk.msra.mxu1 %vm269_vm5, %v580_v7  ;;  %v739_v10 = vpop.permute.xlu0 %738  ;;  %v1747_v6 = vmul.f32 0.041666668, %v1744_v3  ;;  %v1748_v7 = vmul.f32 0.041666668, %v1745_v4 }
  0xca   : > { %2057 = vmatpush1.msk.msra.mxu0 %vm269_vm5, %v578_v8  ;;  %v746_v11 = vsel %vm744_vm8, %v739_v10, %v741_v9  ;;  %2136 = vmatprep.mubr.msk.f32.mxu1 %vm2269_vm3, %v2268_v46  ;;  %v1749_v8 = vfloor.f32 %v1746_v5 }
  0xcb   : > { %2062 = vmatprep.subr.msk.mxu0 %vm269_vm5, %v746_v11  ;;  %v743_v12 = vpop.permute.xlu1 %742  ;;  %654 = vmatprep.mubr.f32.mxu0 %v2268_v46 }
  0xcc   : > { %2139 = vmatprep.subr.mxu1 %v2268_v46  ;;  %v747_v15 = vsel %vm744_vm8, %v741_v9, %v743_v12  ;;  %v1750_v9 = vfloor.f32 %v1747_v6  ;;  %v1752_v11 = vmul.f32 24.0, %v1749_v8 }
  0xcd   : > { %v737_v13 = vpop.permute.xlu0 %736 }
  0xce   : > { %v745_v16 = vsel %vm744_vm8, %v737_v13, %v739_v10  ;;  %v1751_v10 = vfloor.f32 %v1748_v7  ;;  %v1753_v12 = vmul.f32 24.0, %v1750_v9 }
  0xcf   : > { %v908_v17 = vpop.permute.xlu1 %907 }
  0xd0   : > { %2137 = vmatmul.mubr.msk.f32.vlgmr.msra.gmra.mrb[0].mxu1 %vm265_vm6, %v2055_v14  ;;  %v1754_v13 = vmul.f32 24.0, %v1751_v10 }
  0xd1   : > { %2058 = vmatmul.mubr.msk.f32.vlgmr.msra.gmra.mrb[0].mxu0 %vm265_vm6, %v2055_v14  ;;  %2140 = vmatpush3.msk.msra.mxu1 %vm269_vm5, %v747_v15  ;;  %v906_v18 = vpop.permute.xlu0 %905  ;;  %v1755_v14 = vsub.f32 %v1740_v63, %v1752_v11  ;;  %v1756_v15 = vsub.f32 %v1741_v0, %v1753_v12 }
  0xd2   : > { %2063 = vmatpush1.msk.msra.mxu0 %vm269_vm5, %v745_v16  ;;  %v913_v19 = vsel %vm911_vm9, %v906_v18, %v908_v17  ;;  %2141 = vmatprep.mubr.msk.f32.mxu1 %vm2269_vm3, %v2268_v46  ;;  %v1757_v16 = vsub.f32 %v1742_v1, %v1754_v13 }
  0xd3   : > { %2068 = vmatprep.subr.msk.mxu0 %vm269_vm5, %v913_v19  ;;  %v910_v20 = vpop.permute.xlu1 %909  ;;  %821 = vmatprep.mubr.f32.mxu0 %v2268_v46  ;;  %vm1758_vm14 = vcmp.lt.f32.partialorder %v1755_v14, 16.0  ;;  %vm1759_vm15 = vcmp.lt.f32.partialorder %v1756_v15, 16.0 }
  0xd4   : > { %2144 = vmatprep.subr.mxu1 %v2268_v46  ;;  %v914_v23 = vsel %vm911_vm9, %v908_v17, %v910_v20  ;;  %vm1760_vm0 = vcmp.lt.f32.partialorder %v1757_v16, 16.0  ;;  %v2097_v17 = vsel %vm1758_vm14, 1.0, %v2268_v46  ;;  %v2098_v19 = vsel %vm1759_vm15, 1.0, %v2268_v46 }
  0xd5   : > { %v904_v21 = vpop.permute.xlu0 %903  ;;  %v2099_v20 = vsel %vm1760_vm0, 1.0, %v2268_v46 }
  0xd6   : > { %v912_v24 = vsel %vm911_vm9, %v904_v21, %v906_v18 }
  0xd7   : > { %v1075_v25 = vpop.permute.xlu1 %1074 }
  0xd8   : > { %2142 = vmatmul.mubr.msk.f32.vlgmr.msra.gmra.mrb[0].mxu1 %vm265_vm6, %v2061_v22 }
  0xd9   : > { %2064 = vmatmul.mubr.msk.f32.vlgmr.msra.gmra.mrb[0].mxu0 %vm265_vm6, %v2061_v22  ;;  %2145 = vmatpush3.msk.msra.mxu1 %vm269_vm5, %v914_v23  ;;  %v1073_v26 = vpop.permute.xlu0 %1072 }
  0xda   : > { %2069 = vmatpush1.msk.msra.mxu0 %vm269_vm5, %v912_v24  ;;  %v1080_v27 = vsel %vm1078_vm10, %v1073_v26, %v1075_v25  ;;  %2146 = vmatprep.mubr.msk.f32.mxu1 %vm2269_vm3, %v2268_v46 }
  0xdb   : > { %2074 = vmatprep.subr.msk.mxu0 %vm269_vm5, %v1080_v27  ;;  %v1077_v28 = vpop.permute.xlu1 %1076  ;;  %988 = vmatprep.mubr.f32.mxu0 %v2268_v46 }
  0xdc   : > { %2149 = vmatprep.subr.mxu1 %v2268_v46  ;;  %v1081_v31 = vsel %vm1078_vm10, %v1075_v25, %v1077_v28 }
  0xdd   : > { %v1071_v29 = vpop.permute.xlu0 %1070 }
  0xde   : > { %v1079_v32 = vsel %vm1078_vm10, %v1071_v29, %v1073_v26 }
  0xdf   : > { %v1242_v33 = vpop.permute.xlu1 %1241 }
  0xe0   : > { %2147 = vmatmul.mubr.msk.f32.vlgmr.msra.gmra.mrb[0].mxu1 %vm265_vm6, %v2067_v30 }
  0xe1   : > { %2070 = vmatmul.mubr.msk.f32.vlgmr.msra.gmra.mrb[0].mxu0 %vm265_vm6, %v2067_v30  ;;  %2150 = vmatpush3.msk.msra.mxu1 %vm269_vm5, %v1081_v31  ;;  %v1240_v34 = vpop.permute.xlu0 %1239 }
  0xe2   : > { %2075 = vmatpush1.msk.msra.mxu0 %vm269_vm5, %v1079_v32  ;;  %v1247_v35 = vsel %vm1245_vm11, %v1240_v34, %v1242_v33  ;;  %2151 = vmatprep.mubr.msk.f32.mxu1 %vm2269_vm3, %v2268_v46 }
  0xe3   : > { %2080 = vmatprep.subr.msk.mxu0 %vm269_vm5, %v1247_v35  ;;  %v1244_v36 = vpop.permute.xlu1 %1243  ;;  %1155 = vmatprep.mubr.f32.mxu0 %v2268_v46  ;;  %v1778_v35 = vld [vmem:[#allocation3] sm:$0xff] }
  0xe4   : > { %2154 = vmatprep.subr.mxu1 %v2268_v46  ;;  %v1248_v39 = vsel %vm1245_vm11, %v1242_v33, %v1244_v36 }
  0xe5   : > { %v1238_v37 = vpop.permute.xlu0 %1237 }
  0xe6   : > { %v1246_v40 = vsel %vm1245_vm11, %v1238_v37, %v1240_v34  ;;  %v1770_v34 = vld [vmem:[#allocation2] sm:$0xff] }
  0xe7   : > { %v1409_v41 = vpop.permute.xlu1 %1408 }
  0xe8   : > { %2152 = vmatmul.mubr.msk.f32.vlgmr.msra.gmra.mrb[0].mxu1 %vm265_vm6, %v2073_v38 }
  0xe9   : > { %2076 = vmatmul.mubr.msk.f32.vlgmr.msra.gmra.mrb[0].mxu0 %vm265_vm6, %v2073_v38  ;;  %2155 = vmatpush3.msk.msra.mxu1 %vm269_vm5, %v1248_v39  ;;  %v1407_v42 = vpop.permute.xlu0 %1406 }
  0xea   : > { %2081 = vmatpush1.msk.msra.mxu0 %vm269_vm5, %v1246_v40  ;;  %v1414_v43 = vsel %vm1412_vm12, %v1407_v42, %v1409_v41  ;;  %2156 = vmatprep.mubr.msk.f32.mxu1 %vm2269_vm3, %v2268_v46 }
  0xeb   : > { %2086 = vmatprep.subr.msk.mxu0 %vm269_vm5, %v1414_v43  ;;  %v1411_v44 = vpop.permute.xlu1 %1410  ;;  %1322 = vmatprep.mubr.f32.mxu0 %v2268_v46 }
  0xec   : > { %2159 = vmatprep.subr.mxu1 %v2268_v46  ;;  %v1415_v48 = vsel %vm1412_vm12, %v1409_v41, %v1411_v44  ;;  %v2278_v41 = vmov (!%p2101_p5), 0  }
  0xed   : > { %v1405_v45 = vpop.permute.xlu0 %1404  ;;  %2231 = vset.pattern.permute.xlu0 (!%p2101_p5), %v2278_v41 }
  0xee   : > { %v1413_v49 = vsel %vm1412_vm12, %v1405_v45, %v1407_v42 }
  0xef   : > { %v1576_v50 = vpop.permute.xlu1 %1575 }
  0xf0   : > { %2157 = vmatmul.mubr.msk.f32.vlgmr.msra.gmra.mrb[0].mxu1 %vm265_vm6, %v2079_v47 }
  0xf1   : > { %2082 = vmatmul.mubr.msk.f32.vlgmr.msra.gmra.mrb[0].mxu0 %vm265_vm6, %v2079_v47  ;;  %2160 = vmatpush3.msk.msra.mxu1 %vm269_vm5, %v1415_v48  ;;  %v1574_v51 = vpop.permute.xlu0 %1573  ;;  %v1804_v48 = vld [vmem:[%s2638_s2] sm:$0xff] (!%p2101_p5) }
  0xf2   : > { %2087 = vmatpush1.msk.msra.mxu0 %vm269_vm5, %v1413_v49  ;;  %v1581_v52 = vsel %vm1579_vm13, %v1574_v51, %v1576_v50  ;;  %2161 = vmatprep.mubr.msk.f32.mxu1 %vm2269_vm3, %v2268_v46 }
  0xf3   : > { %2092 = vmatprep.subr.msk.mxu0 %vm269_vm5, %v1581_v52  ;;  %v1578_v53 = vpop.permute.xlu1 %1577  ;;  %1489 = vmatprep.mubr.f32.mxu0 %v2268_v46 }
  0xf4   : > { %2164 = vmatprep.subr.mxu1 %v2268_v46  ;;  %v1582_v56 = vsel %vm1579_vm13, %v1576_v50, %v1578_v53 }
  0xf5   : > { %v1572_v54 = vpop.permute.xlu0 %1571 }
  0xf6   : > { %v1580_v57 = vsel %vm1579_vm13, %v1572_v54, %v1574_v51  ;;  %v1808_v51 = vld [vmem:[%s2639_s3] sm:$0xff] (!%p2101_p5) }
  0xf8   : > { %2162 = vmatmul.mubr.msk.f32.vlgmr.msra.gmra.mrb[0].mxu1 %vm265_vm6, %v2085_v55 }
  0xf9   : > { %2088 = vmatmul.mubr.msk.f32.vlgmr.msra.gmra.mrb[0].mxu0 %vm265_vm6, %v2085_v55  ;;  %2165 = vmatpush3.msk.msra.mxu1 %vm269_vm5, %v1582_v56 }
  0xfa   : > { %2093 = vmatpush1.msk.msra.mxu0 %vm269_vm5, %v1580_v57  ;;  %2166 = vmatprep.mubr.msk.f32.mxu1 %vm2269_vm3, %v2268_v46 }
  0xfb   : > { %1656 = vmatprep.mubr.f32.mxu0 %v2268_v46 }
 0x100   : > { %2167 = vmatmul.mubr.msk.f32.vlgmr.msra.gmra.mrb[0].mxu1 %vm265_vm6, %v2091_v58 }
 0x101   : > { %2094 = vmatmul.mubr.msk.f32.vlgmr.msra.gmra.mrb[0].mxu0 %vm265_vm6, %v2091_v58 }
 0x1d3   : > { %v1729_v18 = vpop.f32.mrb[0].mxu1 }
 0x1d4   : > { %1793 = vst [vmem:[%s1790_s27 + $0x10] sm:$0xff] %v1729_v18  ;;  %v1658_v21 = vpop.f32.mrb[0].mxu0  ;;  %v2168_v22 = vpop.f32.mrb[1].mxu1  ;;  %v1769_v26 = vmul.f32 %v2099_v20, %v1729_v18 }
 0x1d5   : > { %v1767_v23 = vmul.f32 %v2097_v17, %v1658_v21  ;;  %1791 = vst [vmem:[%s1790_s27] sm:$0xff] %v1658_v21  ;;  %v1660_v24 = vpop.f32.mrb[1].mxu0 }
 0x1d6   : > { %v1768_v25 = vmul.f32 %v2098_v19, %v1660_v24  ;;  %1792 = vst [vmem:[%s1790_s27 + $0x8] sm:$0xff] %v1660_v24  ;;  %v1781_v31 = vmul.f32 %v1769_v26, %v1729_v18 }
 0x1d7   : > { %v1779_v27 = vmul.f32 %v1767_v23, %v1658_v21 }
 0x1d8   : > { %v1780_v28 = vmul.f32 %v1768_v25, %v1660_v24  ;;  %v1771_v29 = vadd.f32 %v1768_v25, %v1767_v23 }
 0x1da   : > { %v1772_v30 = vadd.f32 %v1771_v29, %v1769_v26  ;;  %v1782_v32 = vadd.f32 %v1780_v28, %v1779_v27 }
 0x1dc   : > { %1773 = vadd.xlane.f32.xlu0 %v1772_v30  ;;  %v1783_v33 = vadd.f32 %v1782_v32, %v1781_v31 }
 0x1dd   : > { %v1811_v55 = vld [vmem:[%s2640_s4] sm:$0xff] (!%p2101_p5)  ;;  %v1812_v56 = vld [vmem:[%s2640_s4 + $0x8] sm:$0xff] (!%p2101_p5)  ;;  %v1813_v57 = vld [vmem:[%s2640_s4 + $0x10] sm:$0xff] (!%p2101_p5) }
 0x1de   : > { %1784 = vadd.xlane.f32.xlu1 %v1783_v33  ;;  %v1814_v58 = vld [vmem:[%s2640_s4 + $0x18] sm:$0xff] (!%p2101_p5)  ;;  %v1815_v59 = vld [vmem:[%s2640_s4 + $0x20] sm:$0xff] (!%p2101_p5)  ;;  %v1816_v60 = vld [vmem:[%s2640_s4 + $0x28] sm:$0xff] (!%p2101_p5) }
 0x268   : > { %1797 = sbr.rel (%p2101_p5) target bundleno = 836 (0x344), region = 44 }
 0x269   : > { %v1774_v46 = vpop.xlane.xlu0 %1773 }
 0x26a   : > { %v1775_v36 = vadd.f32 %v1774_v46, %v1770_v34 }
 0x26b   : > { %v1785_v37 = vpop.xlane.xlu1 %1784 }
 0x26c   : > { %1777 = vst.msk [vmem:[#allocation2] sm:$0xff] %vm1776_vm1, %v1775_v36  ;;  %v1786_v38 = vadd.f32 %v1785_v37, %v1778_v35 }
 0x26e   : > { %1787 = vst.msk [vmem:[#allocation3] sm:$0xff] %vm1776_vm1, %v1786_v38 }
 0x273   : > { %v1798_v39 = vld [vmem:[#allocation2] sm:$0xff] }
 0x274   : > { %v1799_v42 = vmul.f32 0.001953125, %v1798_v39 }
 0x275   : > { %v1800_v40 = vld [vmem:[#allocation3] sm:$0xff] }
 0x276   : > { %v1801_v43 = vmul.f32 0.001953125, %v1800_v40  ;;  %v1802_v44 = vmul.f32 %v1799_v42, %v1799_v42 }
 0x278   : > { %v1803_v45 = vsub.f32 %v1801_v43, %v1802_v44 }
 0x27a   : > { %v1805_v47 = vadd.f32 1e-05, %v1803_v45 }
 0x27c   : > { %2232 = vrsqrt.f32 %v1805_v47 }
 0x286   : > { %v2233_v49 = vpop.eup %2232 }
 0x287   : > { %v1807_v50 = vmul.f32 %v2233_v49, %v1804_v48 }
 0x289   : > { %1819 = vperm.xlu0 %2231, %v1807_v50   ;;  %v1809_v52 = vmul.f32 %v1807_v50, %v1799_v42 }
 0x28b   : > { %v1810_v53 = vsub.f32 %v1808_v51, %v1809_v52 }
 0x28d   : > { %1830 = vperm.xlu0 %2231, %v1810_v53  }
 0x308   : > { %v1820_v54 = vpop.permute.xlu0 %1819 }
 0x309   : > { %v1822_v61 = vmul.f32 %v1820_v54, %v1811_v55  ;;  %v1823_v62 = vmul.f32 %v1820_v54, %v1812_v56  ;;  %v1824_v63 = vmul.f32 %v1820_v54, %v1813_v57  ;;  %v1825_v0 = vmul.f32 %v1820_v54, %v1814_v58 }
 0x30a   : > { %v1826_v1 = vmul.f32 %v1820_v54, %v1815_v59  ;;  %v1827_v2 = vmul.f32 %v1820_v54, %v1816_v60 }
 0x30c   : > { %v1831_v3 = vpop.permute.xlu0 %1830 }
 0x30d   : > { %v1833_v4 = vadd.f32 %v1831_v3, %v1822_v61  ;;  %v2508_v5 = vadd.f32 %v1831_v3, %v1823_v62  ;;  %v2510_v6 = vadd.f32 %v1831_v3, %v1824_v63  ;;  %v2512_v7 = vadd.f32 %v1831_v3, %v1825_v0 }
 0x30e   : > { %v2514_v8 = vadd.f32 %v1831_v3, %v1826_v1  ;;  %v2516_v9 = vadd.f32 %v1831_v3, %v1827_v2 }
 0x30f   : > { %v2518_v10 = vmul.f32 0.70710677, %v1833_v4  ;;  %v2521_v11 = vmul.f32 0.70710677, %v2508_v5  ;;  %v2524_v12 = vmul.f32 0.70710677, %v2510_v6 }
 0x310   : > { %v2527_v13 = vmul.f32 0.70710677, %v2512_v7  ;;  %v2530_v14 = vmul.f32 0.70710677, %v2514_v8  ;;  %v2533_v15 = vmul.f32 0.70710677, %v2516_v9 }
 0x311   : > { %v1863_v16 = vand.u32 2147483647, %v2518_v10  ;;  %v1864_v17 = vand.u32 2147483647, %v2521_v11  ;;  %v1865_v18 = vand.u32 2147483647, %v2524_v12 }
 0x312   : > { %v1866_v19 = vand.u32 2147483647, %v2527_v13  ;;  %v1867_v20 = vand.u32 2147483647, %v2530_v14  ;;  %v1868_v21 = vand.u32 2147483647, %v2533_v15 }
 0x313   : > { %v1869_v22 = vmul.f32 0.3275911, %v1863_v16  ;;  %v1870_v23 = vmul.f32 0.3275911, %v1864_v17  ;;  %v1871_v24 = vmul.f32 0.3275911, %v1865_v18 }
 0x314   : > { %v1872_v25 = vmul.f32 0.3275911, %v1866_v19  ;;  %v1873_v26 = vmul.f32 0.3275911, %v1867_v20  ;;  %v1874_v27 = vmul.f32 0.3275911, %v1868_v21 }
 0x315   : > { %v1875_v28 = vadd.f32 1.0, %v1869_v22  ;;  %v1876_v29 = vadd.f32 1.0, %v1870_v23  ;;  %v1877_v30 = vadd.f32 1.0, %v1871_v24  ;;  %v1947_v34 = vsub.f32 0.0, %v1863_v16 }
 0x316   : > { %v1878_v31 = vadd.f32 1.0, %v1872_v25  ;;  %v1879_v32 = vadd.f32 1.0, %v1873_v26  ;;  %v1880_v33 = vadd.f32 1.0, %v1874_v27  ;;  %v1948_v46 = vsub.f32 0.0, %v1864_v17 }
 0x317   : > { %2234 = vrcp.f32 %v1875_v28  ;;  %v1949_v35 = vsub.f32 0.0, %v1865_v18  ;;  %v1950_v36 = vsub.f32 0.0, %v1866_v19  ;;  %v1951_v37 = vsub.f32 0.0, %v1867_v20 }
 0x318   : > { %2236 = vrcp.f32 %v1876_v29  ;;  %v1953_v38 = vmul.f32 %v1947_v34, %v1863_v16  ;;  %v1952_v39 = vsub.f32 0.0, %v1868_v21  ;;  %v1954_v40 = vmul.f32 %v1948_v46, %v1864_v17 }
 0x319   : > { %2238 = vrcp.f32 %v1877_v30  ;;  %v1955_v42 = vmul.f32 %v1949_v35, %v1865_v18  ;;  %v1956_v45 = vmul.f32 %v1950_v36, %v1866_v19  ;;  %v2548_v48 = vmul.f32 0.5, %v1833_v4 }
 0x31a   : > { %2240 = vrcp.f32 %v1878_v31  ;;  %v1957_v50 = vmul.f32 %v1951_v37, %v1867_v20  ;;  %v1959_v51 = vmul.f32 1.442695, %v1953_v38  ;;  %v1958_v55 = vmul.f32 %v1952_v39, %v1868_v21 }
 0x31b   : > { %2242 = vrcp.f32 %v1879_v32  ;;  %v1961_v56 = vmul.f32 1.442695, %v1954_v40  ;;  %v1963_v60 = vmul.f32 1.442695, %v1955_v42  ;;  %v1965_v1 = vmul.f32 1.442695, %v1956_v45 }
 0x31c   : > { %2244 = vrcp.f32 %v1880_v33  ;;  %v1967_v16 = vmul.f32 1.442695, %v1957_v50  ;;  %v1969_v20 = vmul.f32 1.442695, %v1958_v55  ;;  %v2574_v38 = vmul.f32 0.5, %v2508_v5 }
 0x31d   : > { %2246 = vpow2.f32 %v1959_v51  ;;  %vm1851_vm2 = vcmp.ge.f32.partialorder %v2518_v10, 0.0  ;;  %vm1852_vm3 = vcmp.ge.f32.partialorder %v2521_v11, 0.0  ;;  %vm1853_vm4 = vcmp.ge.f32.partialorder %v2524_v12, 0.0 }
 0x31e   : > { %2248 = vpow2.f32 %v1961_v56  ;;  %vm1854_vm5 = vcmp.ge.f32.partialorder %v2527_v13, 0.0  ;;  %vm1855_vm6 = vcmp.ge.f32.partialorder %v2530_v14, 0.0  ;;  %vm1856_vm7 = vcmp.ge.f32.partialorder %v2533_v15, 0.0 }
 0x31f   : > { %2250 = vpow2.f32 %v1963_v60  ;;  %v1844_v15 = vmul.f32 0.5, %v2516_v9 }
 0x320   : > { %2252 = vpow2.f32 %v1965_v1 }
 0x321   : > { %v2541_v41 = vpop.eup %2234  ;;  %2254 = vpow2.f32 %v1967_v16 }
 0x322   : > { %v2543_v43 = vpop.eup %2236  ;;  %v1893_v44 = vmul.f32 1.0614054, %v2541_v41  ;;  %2256 = vpow2.f32 %v1969_v20 }
 0x323   : > { %v2546_v47 = vpop.eup %2238  ;;  %v1894_v49 = vmul.f32 1.0614054, %v2543_v43 }
 0x324   : > { %v2551_v52 = vpop.eup %2240  ;;  %v1895_v53 = vmul.f32 1.0614054, %v2546_v47  ;;  %v1899_v54 = vadd.f32 -1.4531521, %v1893_v44  ;;  %v2579_v44 = vmul.f32 0.5, %v2510_v6 }
 0x325   : > { %v2554_v57 = vpop.eup %2242  ;;  %v1896_v58 = vmul.f32 1.0614054, %v2551_v52  ;;  %v1900_v59 = vadd.f32 -1.4531521, %v1894_v49 }
 0x326   : > { %v2557_v61 = vpop.eup %2244  ;;  %v1897_v62 = vmul.f32 1.0614054, %v2554_v57  ;;  %v1901_v63 = vadd.f32 -1.4531521, %v1895_v53  ;;  %v1905_v0 = vmul.f32 %v2541_v41, %v1899_v54 }
 0x327   : > { %v1898_v2 = vmul.f32 1.0614054, %v2557_v61  ;;  %v1902_v3 = vadd.f32 -1.4531521, %v1896_v58  ;;  %v1906_v4 = vmul.f32 %v2543_v43, %v1900_v59  ;;  %v2247_v58 = vpop.eup %2246 }
 0x328   : > { %v1903_v17 = vadd.f32 -1.4531521, %v1897_v62  ;;  %v1907_v18 = vmul.f32 %v2546_v47, %v1901_v63  ;;  %v1911_v19 = vadd.f32 1.4214138, %v1905_v0  ;;  %v2249_v62 = vpop.eup %2248 }
 0x329   : > { %v1904_v21 = vadd.f32 -1.4531521, %v1898_v2  ;;  %v1908_v22 = vmul.f32 %v2551_v52, %v1902_v3  ;;  %v1912_v23 = vadd.f32 1.4214138, %v1906_v4  ;;  %v2251_v2 = vpop.eup %2250 }
 0x32a   : > { %v1909_v24 = vmul.f32 %v2554_v57, %v1903_v17  ;;  %v1913_v25 = vadd.f32 1.4214138, %v1907_v18  ;;  %v1917_v26 = vmul.f32 %v2541_v41, %v1911_v19  ;;  %v2253_v16 = vpop.eup %2252  ;;  %v2279_v17 = vmov -1.0  }
 0x32b   : > { %v1910_v27 = vmul.f32 %v2557_v61, %v1904_v21  ;;  %v1914_v28 = vadd.f32 1.4214138, %v1908_v22  ;;  %v1918_v29 = vmul.f32 %v2543_v43, %v1912_v23  ;;  %v1857_v18 = vsel %vm1851_vm2, 1.0, %v2279_v17  ;;  %v2255_v21 = vpop.eup %2254 }
 0x32c   : > { %v1915_v30 = vadd.f32 1.4214138, %v1909_v24  ;;  %v1919_v31 = vmul.f32 %v2546_v47, %v1913_v25  ;;  %v1923_v32 = vadd.f32 -0.28449672, %v1917_v26  ;;  %v2257_v24 = vpop.eup %2256  ;;  %v1859_v10 = vsel %vm1853_vm4, 1.0, %v2279_v17 }
 0x32d   : > { %v1916_v33 = vadd.f32 1.4214138, %v1910_v27  ;;  %v1920_v34 = vmul.f32 %v2551_v52, %v1914_v28  ;;  %v1924_v46 = vadd.f32 -0.28449672, %v1918_v29 }
 0x32e   : > { %v1921_v35 = vmul.f32 %v2554_v57, %v1915_v30  ;;  %v1925_v36 = vadd.f32 -0.28449672, %v1919_v31  ;;  %v1929_v37 = vmul.f32 %v2541_v41, %v1923_v32  ;;  %v1860_v30 = vsel %vm1854_vm5, 1.0, %v2279_v17 }
 0x32f   : > { %v1922_v39 = vmul.f32 %v2557_v61, %v1916_v33  ;;  %v1926_v40 = vadd.f32 -0.28449672, %v1920_v34  ;;  %v1930_v42 = vmul.f32 %v2543_v43, %v1924_v46  ;;  %v1861_v33 = vsel %vm1855_vm6, 1.0, %v2279_v17 }
 0x330   : > { %v1927_v45 = vadd.f32 -0.28449672, %v1921_v35  ;;  %v1931_v49 = vmul.f32 %v2546_v47, %v1925_v36  ;;  %v1935_v50 = vadd.f32 0.2548296, %v1929_v37  ;;  %v1862_v35 = vsel %vm1856_vm7, 1.0, %v2279_v17 }
 0x331   : > { %v1928_v51 = vadd.f32 -0.28449672, %v1922_v39  ;;  %v1932_v53 = vmul.f32 %v2551_v52, %v1926_v40  ;;  %v1936_v54 = vadd.f32 0.2548296, %v1930_v42  ;;  %v1842_v39 = vmul.f32 0.5, %v2512_v7 }
 0x332   : > { %v1933_v5 = vmul.f32 %v2554_v57, %v1927_v45  ;;  %v1937_v55 = vadd.f32 0.2548296, %v1931_v49  ;;  %v1941_v56 = vmul.f32 %v2541_v41, %v1935_v50  ;;  %v1843_v45 = vmul.f32 0.5, %v2514_v8 }
 0x333   : > { %v1934_v6 = vmul.f32 %v2557_v61, %v1928_v51  ;;  %v1938_v59 = vadd.f32 0.2548296, %v1932_v53  ;;  %v1942_v60 = vmul.f32 %v2543_v43, %v1936_v54 }
 0x334   : > { %v1939_v63 = vadd.f32 0.2548296, %v1933_v5  ;;  %v1943_v0 = vmul.f32 %v2546_v47, %v1937_v55  ;;  %v1971_v1 = vmul.f32 %v2247_v58, %v1941_v56 }
 0x335   : > { %v1940_v3 = vadd.f32 0.2548296, %v1934_v6  ;;  %v1944_v41 = vmul.f32 %v2551_v52, %v1938_v59  ;;  %v1972_v4 = vmul.f32 %v2249_v62, %v1942_v60  ;;  %v1858_v52 = vsel %vm1852_vm3, 1.0, %v2279_v17 }
 0x336   : > { %v1945_v43 = vmul.f32 %v2554_v57, %v1939_v63  ;;  %v1973_v19 = vmul.f32 %v2251_v2, %v1943_v0  ;;  %v1977_v20 = vsub.f32 1.0, %v1971_v1 }
 0x337   : > { %v1946_v47 = vmul.f32 %v2557_v61, %v1940_v3  ;;  %v1974_v22 = vmul.f32 %v2253_v16, %v1944_v41  ;;  %v1978_v23 = vsub.f32 1.0, %v1972_v4 }
 0x338   : > { %v1975_v25 = vmul.f32 %v2255_v21, %v1945_v43  ;;  %v1979_v26 = vsub.f32 1.0, %v1973_v19  ;;  %v1983_v27 = vmul.f32 %v1977_v20, %v1857_v18 }
 0x339   : > { %v1976_v57 = vmul.f32 %v2257_v24, %v1946_v47  ;;  %v1980_v28 = vsub.f32 1.0, %v1974_v22  ;;  %v1984_v29 = vmul.f32 %v1978_v23, %v1858_v52 }
 0x33a   : > { %v1981_v31 = vsub.f32 1.0, %v1975_v25  ;;  %v1985_v61 = vmul.f32 %v1979_v26, %v1859_v10  ;;  %v1989_v32 = vadd.f32 1.0, %v1983_v27 }
 0x33b   : > { %v1982_v11 = vsub.f32 1.0, %v1976_v57  ;;  %v1986_v34 = vmul.f32 %v1980_v28, %v1860_v30  ;;  %v1990_v46 = vadd.f32 1.0, %v1984_v29 }
 0x33c   : > { %v1987_v12 = vmul.f32 %v1981_v31, %v1861_v33  ;;  %v1991_v36 = vadd.f32 1.0, %v1985_v61  ;;  %v1995_v37 = vmul.f32 %v1989_v32, %v2548_v48 }
 0x33d   : > { %v1988_v13 = vmul.f32 %v1982_v11, %v1862_v35  ;;  %v1992_v40 = vadd.f32 1.0, %v1986_v34  ;;  %v1996_v42 = vmul.f32 %v1990_v46, %v2574_v38 }
 0x33e   : > { %v1993_v14 = vadd.f32 1.0, %v1987_v12  ;;  %v1997_v49 = vmul.f32 %v1991_v36, %v2579_v44  ;;  %2001 = vst [vmem:[%s2640_s4] sm:$0xff] %v1995_v37 }
 0x33f   : > { %v1994_v50 = vadd.f32 1.0, %v1988_v13  ;;  %v1998_v51 = vmul.f32 %v1992_v40, %v1842_v39  ;;  %2002 = vst [vmem:[%s2640_s4 + $0x8] sm:$0xff] %v1996_v42 }
 0x340   : > { %v1999_v7 = vmul.f32 %v1993_v14, %v1843_v45  ;;  %2003 = vst [vmem:[%s2640_s4 + $0x10] sm:$0xff] %v1997_v49 }
 0x341   : > { %v2000_v8 = vmul.f32 %v1994_v50, %v1844_v15  ;;  %2004 = vst [vmem:[%s2640_s4 + $0x18] sm:$0xff] %v1998_v51 }
 0x342   : > { %2005 = vst [vmem:[%s2640_s4 + $0x20] sm:$0xff] %v1999_v7 }
 0x343   : > { %2006 = vst [vmem:[%s2640_s4 + $0x28] sm:$0xff] %v2000_v8 }
 0x344 PF: > { %s14_s15 = sadd.s32 1, %s2264_s15  }
 0x345   : > { %p11_p6 = scmp.ge.s32.totalorder %s14_s15, 4  }
 0x347   :  { %13 = sbr.rel (!%p11_p6) target bundleno = 1 (0x1), region = 79 }

</bundles_post_ra>
